<compile_context>
chip_gen: v5e
topology: v5e:2x2
jax: 0.10.0
libtpu: 0.0.40
codegen_flags: <defaults>
</compile_context>

<pallas_src>
import jax
import jax.numpy as jnp
from jax.experimental import pallas as pl
from jax.experimental.pallas import tpu as pltpu

# Module-level constants (globals in the original file).
N_FFT = 256
HOP_LENGTH = 64


def _filtered_noise_kernel(nz_ref, filt_ref, fdft_ref, idft_ref, out_ref,
                           frames_scr, y_scr):
  """One group of G (batch*channel) slabs per grid step.

  nz_ref     : (G, T+R-1, HOP)  padded noise, hop-major (R = N_FFT // HOP)
  filt_ref   : (G, T, KH)       filter, DC bin dropped (KH = N_FFT // 2)
  fdft_ref   : (N_FFT, 2*KH)    fused forward real-DFT [cos | -sin]   (bf16)
  idft_ref   : (2*KH, N_FFT)    fused inverse real-DFT * hann window  (bf16)
  out_ref    : (G, T-1, HOP)    cropped overlap-add output
  frames_scr : (G, T, N_FFT)    assembled overlapping frames (VMEM scratch)
  y_scr      : (G, T+2, N_FFT)  windowed frames with zero border rows
  """
  g, t, kh = filt_ref.shape
  n_fft = fdft_ref.shape[0]
  hop = nz_ref.shape[2]
  ratio = n_fft // hop                     # 4
  half = ratio // 2                        # 2 (= crop of N_FFT//2 in hop rows)

  # ---- assemble the 4x-overlapping frames on-chip --------------------------
  # frame t = hop rows t .. t+ratio-1 of the padded noise, concatenated.
  for r in range(ratio):
    frames_scr[:, :, r * hop:(r + 1) * hop] = nz_ref[:, r:r + t, :]

  frames = frames_scr[...].reshape(g * t, n_fft).astype(jnp.bfloat16)

  # ---- rfft (DC dropped): one fused bf16 MXU matmul -> [Re | Im] -----------
  spec = jnp.dot(frames, fdft_ref[...],
                 preferred_element_type=jnp.float32)           # (g*t, 2*KH)

  # ---- frequency-domain filter (real, applied to Re and Im halves, f32) ----
  h = filt_ref[...].reshape(g * t, kh)
  spec = spec * jnp.concatenate([h, h], axis=-1)

  # ---- irfft + Hann window: one fused bf16 MXU matmul ----------------------
  y = jnp.dot(spec.astype(jnp.bfloat16), idft_ref[...],
              preferred_element_type=jnp.float32)              # (g*t, N_FFT)

  # ---- overlap-add + center crop --------------------------------------------
  # y_scr row j holds frame j-1; rows 0 and t+1 are zero so out-of-range
  # frames contribute nothing.  Cropped output hop-row m' is
  #   sum_r frame[m' + half - r][r*hop : (r+1)*hop].
  zero_row = jnp.zeros((g, 1, n_fft), jnp.float32)
  y_scr[:, 0:1, :] = zero_row
  y_scr[:, t + 1:t + 2, :] = zero_row
  y_scr[:, 1:t + 1, :] = y.reshape(g, t, n_fft)

  acc = None
  for r in range(ratio):
    lo = half + 1 - r                       # 3, 2, 1, 0
    piece = y_scr[:, lo:lo + (t - 1), r * hop:(r + 1) * hop]   # (g, t-1, hop)
    acc = piece if acc is None else acc + piece
  out_ref[...] = acc


def _fused_dft_matrices(n_fft):
  """Fused forward [cos | -sin] (N, N) and inverse (1/N, c_k and Hann window
  folded in) (N, N) real-DFT matrices in bf16, with the DC bin dropped."""
  kh = n_fft // 2
  n = jnp.arange(n_fft, dtype=jnp.float32)
  k = jnp.arange(1, kh + 1, dtype=jnp.float32)                  # k = 1 .. N/2
  ang = (2.0 * jnp.pi / n_fft) * n[:, None] * k[None, :]        # (N, KH)
  fwd = jnp.concatenate([jnp.cos(ang), -jnp.sin(ang)], axis=1)  # (N, 2*KH)

  ck = jnp.where(k == kh, 1.0, 2.0) / n_fft                     # irfft weights
  ang_i = (2.0 * jnp.pi / n_fft) * k[:, None] * n[None, :]      # (KH, N)
  inv = jnp.concatenate([ck[:, None] * jnp.cos(ang_i),
                         -ck[:, None] * jnp.sin(ang_i)], axis=0)  # (2*KH, N)
  # torch.hann_window(N_FFT, periodic=False)
  win = 0.5 - 0.5 * jnp.cos(2.0 * jnp.pi * n / (n_fft - 1))
  inv = inv * win[None, :]
  return fwd.astype(jnp.bfloat16), inv.astype(jnp.bfloat16)


def _pick_group(bc, t):
  """Slabs per grid step: batch the matmul M dim toward ~256 rows, keep >=2
  grid steps when possible (two v7x TensorCores), and keep the in-kernel
  (G,T,N)->(G*T,N) reshape tile-aligned (G>1 only when T % 8 == 0)."""
  if t % 8 != 0:
    return 1
  target = max(1, 256 // t)
  g = 1
  for cand in range(1, bc + 1):
    if bc % cand == 0 and cand <= target:
      g = cand
  if bc // g < 2:                      # keep both TensorCores busy if we can
    for cand in range(g, 0, -1):
      if bc % cand == 0 and bc // cand >= 2:
        return cand
  return g


@jax.jit
def filtered_noise_forward(filter_bands, noise):
  """JAX/Pallas equivalent of FilteredNoise.forward.

  filter_bands : (B, C, n_bands, T) float32
  noise        : (B, C, (T-1)*HOP_LENGTH) float32 in [-1, 1)
                 (the torch.rand noise — RNG glue generated outside)
  returns      : (B, C, (T-1)*HOP_LENGTH) float32
  """
  b, c, f_in, t_steps = filter_bands.shape
  n_fft, hop = N_FFT, HOP_LENGTH
  kh = n_fft // 2
  ratio = n_fft // hop
  bc = b * c

  # Padded noise, hop-major: (bc, T + R - 1, HOP). Frames assembled in-kernel.
  padded = jnp.pad(noise.reshape(bc, -1).astype(jnp.float32),
                   ((0, 0), (n_fft // 2, n_fft // 2)))
  nz = padded.reshape(bc, t_steps + ratio - 1, hop)

  # Nearest interpolation of the filter to N_FFT//2 bins (matches
  # F.interpolate(mode='nearest')); the DC bin is NOT prepended — it is
  # identically zero in the reference module and is dropped here.
  src = jnp.clip(
      jnp.floor(jnp.arange(kh, dtype=jnp.float32) * (f_in / kh)).astype(jnp.int32),
      0, f_in - 1)
  filt = jnp.transpose(filter_bands, (0, 1, 3, 2)).reshape(bc, t_steps, f_in)
  filt = jnp.take(filt, src, axis=-1).astype(jnp.float32)        # (bc, T, KH)

  fdft, idft = _fused_dft_matrices(n_fft)

  g = _pick_group(bc, t_steps)
  grid = (bc // g,)

  out = pl.pallas_call(
      _filtered_noise_kernel,
      out_shape=jax.ShapeDtypeStruct((bc, t_steps - 1, hop), jnp.float32),
      grid_spec=pltpu.PrefetchScalarGridSpec(
          num_scalar_prefetch=0,
          grid=grid,
          in_specs=[
              pl.BlockSpec((g, t_steps + ratio - 1, hop), lambda i: (i, 0, 0)),
              pl.BlockSpec((g, t_steps, kh), lambda i: (i, 0, 0)),
              pl.BlockSpec((n_fft, 2 * kh), lambda i: (0, 0)),
              pl.BlockSpec((2 * kh, n_fft), lambda i: (0, 0)),
          ],
          out_specs=pl.BlockSpec((g, t_steps - 1, hop), lambda i: (i, 0, 0)),
          scratch_shapes=[
              pltpu.VMEM((g, t_steps, n_fft), jnp.float32),      # frames
              pltpu.VMEM((g, t_steps + 2, n_fft), jnp.float32),  # windowed y
          ],
      ),
      compiler_params=pltpu.CompilerParams(
          dimension_semantics=("parallel",),
          vmem_limit_bytes=32 * 1024 * 1024,
      ),
  )(nz, filt, fdft, idft)

  return out.reshape(b, c, (t_steps - 1) * hop)


def _reference(filter_bands, noise):
  """Plain-JAX reference (uses jnp.fft, f32) for a numerical sanity check."""
  b, c, f_in, t_steps = filter_bands.shape
  n_fft, hop = N_FFT, HOP_LENGTH
  kh = n_fft // 2
  padded = jnp.pad(noise, ((0, 0), (0, 0), (n_fft // 2, n_fft // 2)))
  idx = jnp.arange(t_steps)[:, None] * hop + jnp.arange(n_fft)[None, :]
  frames = padded[:, :, idx]                         # (B, C, T, N)

  src = jnp.clip(jnp.floor(jnp.arange(kh) * (f_in / kh)).astype(jnp.int32),
                 0, f_in - 1)
  filt = jnp.transpose(filter_bands, (0, 1, 3, 2))[..., src]
  dc = jnp.zeros(filt.shape[:-1] + (1,), filt.dtype)
  filt = jnp.concatenate([dc, filt], axis=-1)        # (B, C, T, Kf)

  spec = jnp.fft.rfft(frames, axis=-1)
  y = jnp.fft.irfft(filt * spec, n=n_fft, axis=-1)
  n = jnp.arange(n_fft, dtype=jnp.float32)
  win = 0.5 - 0.5 * jnp.cos(2.0 * jnp.pi * n / (n_fft - 1))   # periodic=False
  y = y * win

  l_pad = padded.shape[-1]
  out = jnp.zeros((b, c, l_pad), jnp.float32)
  for t in range(t_steps):
    out = out.at[:, :, t * hop:t * hop + n_fft].add(y[:, :, t, :])
  return out[:, :, n_fft // 2:-(n_fft // 2)]


if __name__ == "__main__":
  # FilteredNoise(n_bands=128, n_channels=1); small synthetic shapes.
  B, C, N_BANDS, T = 2, 1, 128, 8

  key = jax.random.PRNGKey(0)
  k_filt, k_noise = jax.random.split(key)
  filter_bands = jax.random.uniform(k_filt, (B, C, N_BANDS, T), jnp.float32)
  # init_noise: torch.rand(...) * 2 - 1  (RNG glue, generated deterministically)
  noise = jax.random.uniform(k_noise, (B, C, (T - 1) * HOP_LENGTH),
                             jnp.float32, minval=-1.0, maxval=1.0)

  out = filtered_noise_forward(filter_bands, noise)
  out = jax.block_until_ready(out)

  ref = _reference(filter_bands, noise)
  max_err = float(jnp.max(jnp.abs(out - ref)))
  assert out.shape == (B, C, (T - 1) * HOP_LENGTH), out.shape
  # bf16 MXU matmuls (f32 accumulation) vs the f32 FFT reference.
  assert max_err < 2e-2, f"max abs error vs FFT reference: {max_err}"

  print("KERNEL_OK")
</pallas_src>

<mosaic_0001>
module attributes {stable_mosaic.version = 11 : i64} {
  func.func @_filtered_noise_kernel(%arg0: i32, %arg1: memref<1x11x64xf32, #tpu.memory_space<vmem>>, %arg2: memref<1x8x128xf32, #tpu.memory_space<vmem>>, %arg3: memref<256x256xbf16, #tpu.memory_space<vmem>>, %arg4: memref<256x256xbf16, #tpu.memory_space<vmem>>, %arg5: memref<1x7x64xf32, #tpu.memory_space<vmem>>, %arg6: memref<1x8x256xf32, #tpu.memory_space<vmem>>, %arg7: memref<1x10x256xf32, #tpu.memory_space<vmem>>) attributes {dimension_semantics = [#tpu.dimension_semantics<parallel>], iteration_bounds = array<i64: 2>, scalar_prefetch = 0 : i64, scratch_operands = 2 : i64, tpu.core_type = #tpu.core_type<tc>, window_params = [{transform_indices = @transform_0, window_bounds = array<i64: 1, 11, 64>}, {transform_indices = @transform_1, window_bounds = array<i64: 1, 8, 128>}, {pipeline_mode = #tpu.pipeline_mode<synchronous>, transform_indices = @transform_2, window_bounds = array<i64: 256, 256>}, {pipeline_mode = #tpu.pipeline_mode<synchronous>, transform_indices = @transform_3, window_bounds = array<i64: 256, 256>}, {transform_indices = @transform_4, window_bounds = array<i64: 1, 7, 64>}]} {
    %c0 = arith.constant 0 : index
    %c0_0 = arith.constant 0 : index
    %c0_1 = arith.constant 0 : index
    %0 = vector.load %arg1[%c0, %c0_0, %c0_1] : memref<1x11x64xf32, #tpu.memory_space<vmem>>, vector<1x8x64xf32>
    %c0_2 = arith.constant 0 : index
    %c0_3 = arith.constant 0 : index
    %c0_4 = arith.constant 0 : index
    %1 = vector.load %arg6[%c0_2, %c0_3, %c0_4] : memref<1x8x256xf32, #tpu.memory_space<vmem>>, vector<1x8x64xf32>
    tpu.vector_store %arg6[%c0_2, %c0_3, %c0_4], %0 {strides = array<i32>} : memref<1x8x256xf32, #tpu.memory_space<vmem>>, vector<1x8x64xf32>,
    %c0_5 = arith.constant 0 : index
    %c1 = arith.constant 1 : index
    %c0_6 = arith.constant 0 : index
    %2 = vector.load %arg1[%c0_5, %c1, %c0_6] : memref<1x11x64xf32, #tpu.memory_space<vmem>>, vector<1x8x64xf32>
    %c0_7 = arith.constant 0 : index
    %c0_8 = arith.constant 0 : index
    %c64 = arith.constant 64 : index
    %3 = vector.load %arg6[%c0_7, %c0_8, %c64] : memref<1x8x256xf32, #tpu.memory_space<vmem>>, vector<1x8x64xf32>
    tpu.vector_store %arg6[%c0_7, %c0_8, %c64], %2 {strides = array<i32>} : memref<1x8x256xf32, #tpu.memory_space<vmem>>, vector<1x8x64xf32>,
    %c0_9 = arith.constant 0 : index
    %c2 = arith.constant 2 : index
    %c0_10 = arith.constant 0 : index
    %4 = vector.load %arg1[%c0_9, %c2, %c0_10] : memref<1x11x64xf32, #tpu.memory_space<vmem>>, vector<1x8x64xf32>
    %c0_11 = arith.constant 0 : index
    %c0_12 = arith.constant 0 : index
    %c128 = arith.constant 128 : index
    %5 = vector.load %arg6[%c0_11, %c0_12, %c128] : memref<1x8x256xf32, #tpu.memory_space<vmem>>, vector<1x8x64xf32>
    tpu.vector_store %arg6[%c0_11, %c0_12, %c128], %4 {strides = array<i32>} : memref<1x8x256xf32, #tpu.memory_space<vmem>>, vector<1x8x64xf32>,
    %c0_13 = arith.constant 0 : index
    %c3 = arith.constant 3 : index
    %c0_14 = arith.constant 0 : index
    %6 = vector.load %arg1[%c0_13, %c3, %c0_14] : memref<1x11x64xf32, #tpu.memory_space<vmem>>, vector<1x8x64xf32>
    %c0_15 = arith.constant 0 : index
    %c0_16 = arith.constant 0 : index
    %c192 = arith.constant 192 : index
    %7 = vector.load %arg6[%c0_15, %c0_16, %c192] : memref<1x8x256xf32, #tpu.memory_space<vmem>>, vector<1x8x64xf32>
    tpu.vector_store %arg6[%c0_15, %c0_16, %c192], %6 {strides = array<i32>} : memref<1x8x256xf32, #tpu.memory_space<vmem>>, vector<1x8x64xf32>,
    %c0_17 = arith.constant 0 : index
    %c0_18 = arith.constant 0 : index
    %c0_19 = arith.constant 0 : index
    %8 = vector.load %arg6[%c0_17, %c0_18, %c0_19] : memref<1x8x256xf32, #tpu.memory_space<vmem>>, vector<1x8x256xf32>
    %9 = vector.shape_cast %8 : vector<1x8x256xf32> to vector<8x256xf32>
    %10 = arith.truncf %9 : vector<8x256xf32> to vector<8x256xbf16>
    %c0_20 = arith.constant 0 : index
    %c0_21 = arith.constant 0 : index
    %11 = vector.load %arg3[%c0_20, %c0_21] : memref<256x256xbf16, #tpu.memory_space<vmem>>, vector<256x256xbf16>
    %cst = arith.constant dense<0.000000e+00> : vector<8x256xf32>
    %12 = tpu.matmul %10, %11, %cst {dimension_numbers = #tpu.dot_dimension_numbers<[1], [0], [0], [1], [0, 0, 1, 1], [], []>} : vector<8x256xbf16>, vector<256x256xbf16>, vector<8x256xf32> -> vector<8x256xf32>
    %c0_22 = arith.constant 0 : index
    %c0_23 = arith.constant 0 : index
    %c0_24 = arith.constant 0 : index
    %13 = vector.load %arg2[%c0_22, %c0_23, %c0_24] : memref<1x8x128xf32, #tpu.memory_space<vmem>>, vector<1x8x128xf32>
    %14 = vector.shape_cast %13 : vector<1x8x128xf32> to vector<8x128xf32>
    %15 = tpu.concatenate %14, %14 in 1 : vector<8x128xf32>, vector<8x128xf32> -> vector<8x256xf32>
    %16 = arith.mulf %12, %15 : vector<8x256xf32>
    %17 = arith.truncf %16 : vector<8x256xf32> to vector<8x256xbf16>
    %c0_25 = arith.constant 0 : index
    %c0_26 = arith.constant 0 : index
    %18 = vector.load %arg4[%c0_25, %c0_26] : memref<256x256xbf16, #tpu.memory_space<vmem>>, vector<256x256xbf16>
    %cst_27 = arith.constant dense<0.000000e+00> : vector<8x256xf32>
    %19 = tpu.matmul %17, %18, %cst_27 {dimension_numbers = #tpu.dot_dimension_numbers<[1], [0], [0], [1], [0, 0, 1, 1], [], []>} : vector<8x256xbf16>, vector<256x256xbf16>, vector<8x256xf32> -> vector<8x256xf32>
    %cst_28 = arith.constant 0.000000e+00 : f32
    %20 = vector.broadcast %cst_28 : f32 to vector<1x1x256xf32>
    %c0_29 = arith.constant 0 : index
    %c0_30 = arith.constant 0 : index
    %c0_31 = arith.constant 0 : index
    %21 = vector.load %arg7[%c0_29, %c0_30, %c0_31] : memref<1x10x256xf32, #tpu.memory_space<vmem>>, vector<1x1x256xf32>
    tpu.vector_store %arg7[%c0_29, %c0_30, %c0_31], %20 {strides = array<i32>} : memref<1x10x256xf32, #tpu.memory_space<vmem>>, vector<1x1x256xf32>,
    %c0_32 = arith.constant 0 : index
    %c9 = arith.constant 9 : index
    %c0_33 = arith.constant 0 : index
    %22 = vector.load %arg7[%c0_32, %c9, %c0_33] : memref<1x10x256xf32, #tpu.memory_space<vmem>>, vector<1x1x256xf32>
    tpu.vector_store %arg7[%c0_32, %c9, %c0_33], %20 {strides = array<i32>} : memref<1x10x256xf32, #tpu.memory_space<vmem>>, vector<1x1x256xf32>,
    %23 = vector.shape_cast %19 : vector<8x256xf32> to vector<1x8x256xf32>
    %c0_34 = arith.constant 0 : index
    %c1_35 = arith.constant 1 : index
    %c0_36 = arith.constant 0 : index
    %24 = vector.load %arg7[%c0_34, %c1_35, %c0_36] : memref<1x10x256xf32, #tpu.memory_space<vmem>>, vector<1x8x256xf32>
    tpu.vector_store %arg7[%c0_34, %c1_35, %c0_36], %23 {strides = array<i32>} : memref<1x10x256xf32, #tpu.memory_space<vmem>>, vector<1x8x256xf32>,
    %c0_37 = arith.constant 0 : index
    %c3_38 = arith.constant 3 : index
    %c0_39 = arith.constant 0 : index
    %25 = vector.load %arg7[%c0_37, %c3_38, %c0_39] : memref<1x10x256xf32, #tpu.memory_space<vmem>>, vector<1x7x64xf32>
    %c0_40 = arith.constant 0 : index
    %c2_41 = arith.constant 2 : index
    %c64_42 = arith.constant 64 : index
    %26 = vector.load %arg7[%c0_40, %c2_41, %c64_42] : memref<1x10x256xf32, #tpu.memory_space<vmem>>, vector<1x7x64xf32>
    %27 = arith.addf %25, %26 : vector<1x7x64xf32>
    %c0_43 = arith.constant 0 : index
    %c1_44 = arith.constant 1 : index
    %c128_45 = arith.constant 128 : index
    %28 = vector.load %arg7[%c0_43, %c1_44, %c128_45] : memref<1x10x256xf32, #tpu.memory_space<vmem>>, vector<1x7x64xf32>
    %29 = arith.addf %27, %28 : vector<1x7x64xf32>
    %c0_46 = arith.constant 0 : index
    %c0_47 = arith.constant 0 : index
    %c192_48 = arith.constant 192 : index
    %30 = vector.load %arg7[%c0_46, %c0_47, %c192_48] : memref<1x10x256xf32, #tpu.memory_space<vmem>>, vector<1x7x64xf32>
    %31 = arith.addf %29, %30 : vector<1x7x64xf32>
    %c0_49 = arith.constant 0 : index
    %c0_50 = arith.constant 0 : index
    %c0_51 = arith.constant 0 : index
    %32 = vector.load %arg5[%c0_49, %c0_50, %c0_51] : memref<1x7x64xf32, #tpu.memory_space<vmem>>, vector<1x7x64xf32>
    tpu.vector_store %arg5[%c0_49, %c0_50, %c0_51], %31 {strides = array<i32>} : memref<1x7x64xf32, #tpu.memory_space<vmem>>, vector<1x7x64xf32>,
    return
  }
  func.func @transform_0(%arg0: i32) -> (i32, i32, i32) {
    %c0_i32 = arith.constant 0 : i32
    %c0_i32_0 = arith.constant 0 : i32
    %c0_i32_1 = arith.constant 0 : i32
    return %arg0, %c0_i32, %c0_i32_0 : i32, i32, i32
  }
  func.func @transform_1(%arg0: i32) -> (i32, i32, i32) {
    %c0_i32 = arith.constant 0 : i32
    %c0_i32_0 = arith.constant 0 : i32
    %c0_i32_1 = arith.constant 0 : i32
    return %arg0, %c0_i32, %c0_i32_0 : i32, i32, i32
  }
  func.func @transform_2(%arg0: i32) -> (i32, i32) {
    %c0_i32 = arith.constant 0 : i32
    %c0_i32_0 = arith.constant 0 : i32
    %c0_i32_1 = arith.constant 0 : i32
    return %c0_i32, %c0_i32_0 : i32, i32
  }
  func.func @transform_3(%arg0: i32) -> (i32, i32) {
    %c0_i32 = arith.constant 0 : i32
    %c0_i32_0 = arith.constant 0 : i32
    %c0_i32_1 = arith.constant 0 : i32
    return %c0_i32, %c0_i32_0 : i32, i32
  }
  func.func @transform_4(%arg0: i32) -> (i32, i32, i32) {
    %c0_i32 = arith.constant 0 : i32
    %c0_i32_0 = arith.constant 0 : i32
    %c0_i32_1 = arith.constant 0 : i32
    return %arg0, %c0_i32, %c0_i32_0 : i32, i32, i32
  }
}

</mosaic_0001>

<bundles_post_ra>
// kernel: filtered_noise_forward.1
= control target key start
LH: loop header
LB: loop body
LE: loop exit
PB: predicated region body
PF: predicated region fallthrough
CT: control target
= control target key end

     0   :  { %s1225_s15 = smov 0   ;;  %s1650_s0 = inlined_call_operand.vmem [shape: f32[2,11,64], index: 0, kind: input, shape index: {}]   ;;  %s1651_s1 = inlined_call_operand.vmem [shape: f32[2,8,128], index: 1, kind: input, shape index: {}]   ;;  %s1652_s2 = inlined_call_operand.vmem [shape: bf16[256,256], index: 2, kind: input, shape index: {}]   ;;  %s1653_s3 = inlined_call_operand.vmem [shape: bf16[256,256], index: 3, kind: input, shape index: {}]   ;;  %s1654_s4 = inlined_call_operand.vmem [shape: f32[2,7,64], index: 4, kind: output, shape index: {}]  }
   0x1 LB: > { %s848_s16 = sadd.s32 4294967295, %s1196_s15   ;;  %p852_p0 = scmp.ge.s32.totalorder %s1196_s15, 1  ;;  %s1196_s15 = sphi %s1225_s15, %s14_s15  }
   0x2   : > { %p171_p1 = scmp.lt.s32.totalorder %s1196_s15, 3 }
   0x4   : > { %p172_p2 = pnand %p852_p0, %p171_p1 }
   0x5   : > { %p200_p3 = scmp.lt.s32.totalorder (!%p172_p2), %s848_s16, 1  ;;  %s1198_s29 = smov (!%p172_p2), 64  }
   0x6   : > { %175 = sbr.rel (%p172_p2) target bundleno = 558 (0x22e), region = 36 }
   0xb   : > { %v915_v0 = vld [vmem:[%s1652_s2 + $0x70] sm:$0xf]  ;;  %v1131_v1 = vld [vmem:[%s1652_s2 + $0x74] sm:$0xf0]  ;;  %v1130_v3 = vld [vmem:[%s1652_s2 + $0x74] sm:$0xf] }
   0xc   : > { %v916_v2 = vor.u32 %v1131_v1, %v915_v0  ;;  %v917_v4 = vld [vmem:[%s1652_s2 + $0x78] sm:$0xf0]  ;;  %v907_v5 = vld [vmem:[%s1652_s2 + $0x60] sm:$0xf]  ;;  %s1656_s16 = smov (!%p200_p3, %s848_s16), 1  ;;  %vm214_vm0 = vcmask 523264  }
   0xd   : > { %v920_v6 = vor.u32 %v1130_v3, %v917_v4  ;;  %v1129_v7 = vld [vmem:[%s1652_s2 + $0x64] sm:$0xf0]  ;;  %v1128_v8 = vld [vmem:[%s1652_s2 + $0x64] sm:$0xf]  ;;  %v909_v10 = vld [vmem:[%s1652_s2 + $0x68] sm:$0xf0] }
   0xe   : > { %427 = vmatpush.bf16.msra.mxu0 %v916_v2  ;;  %v908_v9 = vor.u32 %v1129_v7, %v907_v5  ;;  %v899_v11 = vld [vmem:[%s1652_s2 + $0x50] sm:$0xf]  ;;  %v1127_v12 = vld [vmem:[%s1652_s2 + $0x54] sm:$0xf0]  ;;  %s1115_s11 = sshll.u32 %s1656_s16, 4  ;;  %v912_v13 = vor.u32 %v1128_v8, %v909_v10  ;;  %vm221_vm1 = vcmask 1048064  }
   0xf   : > { %453 = vmatpush.bf16.msra.mxu2 %v920_v6  ;;  %v979_v14 = vld [vmem:[%s1652_s2 + $0xf0] sm:$0xf]  ;;  %v1147_v15 = vld [vmem:[%s1652_s2 + $0xf4] sm:$0xf0]  ;;  %s1275_s20 = scalar_lea.vmem %s1650_s0, %s1115_s11  ;;  %v1126_v17 = vld [vmem:[%s1652_s2 + $0x54] sm:$0xf]  ;;  %v900_v22 = vor.u32 %v1127_v12, %v899_v11 }
  0x10   : > { %v980_v16 = vor.u32 %v1147_v15, %v979_v14  ;;  %v901_v18 = vld [vmem:[%s1652_s2 + $0x58] sm:$0xf0]  ;;  %v1146_v19 = vld [vmem:[%s1652_s2 + $0xf4] sm:$0xf]  ;;  %v216_v20 = vld [vmem:[%s1275_s20 + $0x1] sm:$0xff]  ;;  %vm753_vm3 = vcmask 1040384  }
  0x11   : > { %v981_v21 = vld [vmem:[%s1652_s2 + $0xf8] sm:$0xf0]  ;;  %218 = vrot.lane.b32.xlu0 %v216_v20, %s1198_s29  ;;  %v891_v24 = vld [vmem:[%s1652_s2 + $0x40] sm:$0xf]  ;;  %v904_v26 = vor.u32 %v1126_v17, %v901_v18  ;;  %v1125_v27 = vld [vmem:[%s1652_s2 + $0x44] sm:$0xf0] }
  0x12   : > { %428 = vmatpush.bf16.msra.mxu0 %v908_v9  ;;  %v984_v23 = vor.u32 %v1146_v19, %v981_v21  ;;  %v971_v25 = vld [vmem:[%s1652_s2 + $0xe0] sm:$0xf]  ;;  %440 = vmatpush.bf16.msra.mxu1 %v980_v16  ;;  %v1145_v28 = vld [vmem:[%s1652_s2 + $0xe4] sm:$0xf0]  ;;  %v1124_v29 = vld [vmem:[%s1652_s2 + $0x44] sm:$0xf]  ;;  %v892_v38 = vor.u32 %v1125_v27, %v891_v24 }
  0x13   : > { %454 = vmatpush.bf16.msra.mxu2 %v912_v13  ;;  %v972_v30 = vor.u32 %v1145_v28, %v971_v25  ;;  %v893_v31 = vld [vmem:[%s1652_s2 + $0x48] sm:$0xf0]  ;;  %v1144_v32 = vld [vmem:[%s1652_s2 + $0xe4] sm:$0xf]  ;;  %v963_v35 = vld [vmem:[%s1652_s2 + $0xd0] sm:$0xf] }
  0x14   : > { %466 = vmatpush.bf16.msra.mxu3 %v984_v23  ;;  %v973_v33 = vld [vmem:[%s1652_s2 + $0xe8] sm:$0xf0]  ;;  %v1143_v36 = vld [vmem:[%s1652_s2 + $0xd4] sm:$0xf0]  ;;  %v225_v37 = vld [vmem:[%s1275_s20 + $0x3] sm:$0xff]  ;;  %v896_v41 = vor.u32 %v1124_v29, %v893_v31  ;;  %vm779_vm4 = vcmask 523267  }
  0x15   : > { %v976_v34 = vor.u32 %v1144_v32, %v973_v33  ;;  %v883_v39 = vld [vmem:[%s1652_s2 + $0x30] sm:$0xf]  ;;  %v1142_v40 = vld [vmem:[%s1652_s2 + $0xd4] sm:$0xf]  ;;  %v1123_v42 = vld [vmem:[%s1652_s2 + $0x34] sm:$0xf0]  ;;  %v964_v43 = vor.u32 %v1143_v36, %v963_v35 }
  0x16   : > { %429 = vmatpush.bf16.msra.mxu0 %v900_v22  ;;  %441 = vmatpush.bf16.msra.mxu1 %v972_v30  ;;  %v1122_v44 = vld [vmem:[%s1652_s2 + $0x34] sm:$0xf]  ;;  %v965_v45 = vld [vmem:[%s1652_s2 + $0xd8] sm:$0xf0]  ;;  %v955_v48 = vld [vmem:[%s1652_s2 + $0xc0] sm:$0xf]  ;;  %v884_v52 = vor.u32 %v1123_v42, %v883_v39 }
  0x17   : > { %455 = vmatpush.bf16.msra.mxu2 %v904_v26  ;;  %v885_v46 = vld [vmem:[%s1652_s2 + $0x38] sm:$0xf0]  ;;  %v968_v47 = vor.u32 %v1142_v40, %v965_v45  ;;  %v1141_v49 = vld [vmem:[%s1652_s2 + $0xc4] sm:$0xf0]  ;;  %v1140_v50 = vld [vmem:[%s1652_s2 + $0xc4] sm:$0xf] }
  0x18   : > { %467 = vmatpush.bf16.msra.mxu3 %v976_v34  ;;  %v957_v51 = vld [vmem:[%s1652_s2 + $0xc8] sm:$0xf0]  ;;  %v888_v53 = vor.u32 %v1122_v44, %v885_v46  ;;  %v875_v54 = vld [vmem:[%s1652_s2 + $0x20] sm:$0xf]  ;;  %v1121_v55 = vld [vmem:[%s1652_s2 + $0x24] sm:$0xf0]  ;;  %v956_v56 = vor.u32 %v1141_v49, %v955_v48 }
  0x19   : > { %227 = vrot.lane.b32.xlu0 %v225_v37, %s1198_s29  ;;  %v1120_v57 = vld [vmem:[%s1652_s2 + $0x24] sm:$0xf]  ;;  %v877_v58 = vld [vmem:[%s1652_s2 + $0x28] sm:$0xf0]  ;;  %v960_v59 = vor.u32 %v1140_v50, %v957_v51  ;;  %v876_v60 = vor.u32 %v1121_v55, %v875_v54  ;;  %v867_v63 = vld [vmem:[%s1652_s2 + $0x10] sm:$0xf] }
  0x1a   : > { %430 = vmatpush.bf16.msra.mxu0 %v892_v38  ;;  %442 = vmatpush.bf16.msra.mxu1 %v964_v43  ;;  %v880_v61 = vor.u32 %v1120_v57, %v877_v58  ;;  %v213_v62 = vld [vmem:[%s1275_s20] sm:$0xff]  ;;  %v1119_v0 = vld [vmem:[%s1652_s2 + $0x14] sm:$0xf0]  ;;  %v947_v1 = vld [vmem:[%s1652_s2 + $0xb0] sm:$0xf]  ;;  %vm781_vm5 = vcmask 517120  }
  0x1b   : > { %456 = vmatpush.bf16.msra.mxu2 %v896_v41  ;;  %215 = vst.msk [vmem:[#allocation2] sm:$0xff] %vm214_vm0, %v213_v62  ;;  %v868_v2 = vor.u32 %v1119_v0, %v867_v63  ;;  %v1139_v3 = vld [vmem:[%s1652_s2 + $0xb4] sm:$0xf0]  ;;  %v1118_v4 = vld [vmem:[%s1652_s2 + $0x14] sm:$0xf]  ;;  %v223_v22 = vld [vmem:[%s1275_s20 + $0x2] sm:$0xff] }
  0x1c   : > { %468 = vmatpush.bf16.msra.mxu3 %v968_v47  ;;  %v869_v5 = vld [vmem:[%s1652_s2 + $0x18] sm:$0xf0]  ;;  %v948_v6 = vor.u32 %v1139_v3, %v947_v1  ;;  %v1138_v8 = vld [vmem:[%s1652_s2 + $0xb4] sm:$0xf]  ;;  %v859_v10 = vld [vmem:[%s1652_s2] sm:$0xf] }
  0x1d   : > { %v872_v7 = vor.u32 %v1118_v4, %v869_v5  ;;  %v949_v9 = vld [vmem:[%s1652_s2 + $0xb8] sm:$0xf0]  ;;  %v1117_v12 = vld [vmem:[%s1652_s2 + $0x4] sm:$0xf0]  ;;  %v939_v13 = vld [vmem:[%s1652_s2 + $0xa0] sm:$0xf] }
  0x1e   : > { %431 = vmatpush.bf16.msra.mxu0 %v884_v52  ;;  %443 = vmatpush.bf16.msra.mxu1 %v956_v56  ;;  %v952_v11 = vor.u32 %v1138_v8, %v949_v9  ;;  %v1137_v14 = vld [vmem:[%s1652_s2 + $0xa4] sm:$0xf0]  ;;  %v860_v15 = vor.u32 %v1117_v12, %v859_v10  ;;  %v1116_v17 = vld [vmem:[%s1652_s2 + $0x4] sm:$0xf]  ;;  %v861_v18 = vld [vmem:[%s1652_s2 + $0x8] sm:$0xf0] }
  0x1f   : > { %457 = vmatpush.bf16.msra.mxu2 %v888_v53  ;;  %v940_v16 = vor.u32 %v1137_v14, %v939_v13  ;;  %v1136_v19 = vld [vmem:[%s1652_s2 + $0xa4] sm:$0xf]  ;;  %v864_v20 = vor.u32 %v1116_v17, %v861_v18  ;;  %v941_v21 = vld [vmem:[%s1652_s2 + $0xa8] sm:$0xf0]  ;;  %224 = vst.msk [vmem:[#allocation2 + $0x8] sm:$0xff] %vm214_vm0, %v223_v22  ;;  %s855_s20 = sshll.u32 %s1656_s16, 3 }
  0x20   : > { %469 = vmatpush.bf16.msra.mxu3 %v960_v59  ;;  %v944_v23 = vor.u32 %v1136_v19, %v941_v21  ;;  %v931_v24 = vld [vmem:[%s1652_s2 + $0x90] sm:$0xf]  ;;  %v1135_v25 = vld [vmem:[%s1652_s2 + $0x94] sm:$0xf0]  ;;  %v1134_v26 = vld [vmem:[%s1652_s2 + $0x94] sm:$0xf]  ;;  %s208_s30 = scalar_lea.vmem %s1651_s1, %s855_s20  ;;  %s212_s7 = scalar_lea.vmem %s1654_s4, %s855_s20 }
  0x21   : > { %v932_v27 = vor.u32 %v1135_v25, %v931_v24  ;;  %v933_v28 = vld [vmem:[%s1652_s2 + $0x98] sm:$0xf0]  ;;  %v923_v30 = vld [vmem:[%s1652_s2 + $0x80] sm:$0xf]  ;;  %v1133_v31 = vld [vmem:[%s1652_s2 + $0x84] sm:$0xf0] }
  0x22   : > { %432 = vmatpush.bf16.msra.mxu0 %v876_v60  ;;  %444 = vmatpush.bf16.msra.mxu1 %v948_v6  ;;  %v936_v29 = vor.u32 %v1134_v26, %v933_v28  ;;  %v1132_v32 = vld [vmem:[%s1652_s2 + $0x84] sm:$0xf]  ;;  %v925_v33 = vld [vmem:[%s1652_s2 + $0x88] sm:$0xf0]  ;;  %v924_v34 = vor.u32 %v1133_v31, %v923_v30  ;;  %v1043_v36 = vld [vmem:[%s1653_s3 + $0x70] sm:$0xf] }
  0x23   : > { %458 = vmatpush.bf16.msra.mxu2 %v880_v61  ;;  %v928_v35 = vor.u32 %v1132_v32, %v925_v33  ;;  %v1163_v37 = vld [vmem:[%s1653_s3 + $0x74] sm:$0xf0]  ;;  %v1162_v38 = vld [vmem:[%s1653_s3 + $0x74] sm:$0xf]  ;;  %v1045_v40 = vld [vmem:[%s1653_s3 + $0x78] sm:$0xf0] }
  0x24   : > { %470 = vmatpush.bf16.msra.mxu3 %v952_v11  ;;  %v1044_v39 = vor.u32 %v1163_v37, %v1043_v36  ;;  %v1035_v41 = vld [vmem:[%s1653_s3 + $0x60] sm:$0xf]  ;;  %v1161_v42 = vld [vmem:[%s1653_s3 + $0x64] sm:$0xf0]  ;;  %v1048_v43 = vor.u32 %v1162_v38, %v1045_v40  ;;  %v1160_v44 = vld [vmem:[%s1653_s3 + $0x64] sm:$0xf] }
  0x25   : > { %v1037_v45 = vld [vmem:[%s1653_s3 + $0x68] sm:$0xf0]  ;;  %v1107_v46 = vld [vmem:[%s1653_s3 + $0xf0] sm:$0xf]  ;;  %v1036_v47 = vor.u32 %v1161_v42, %v1035_v41  ;;  %v1179_v48 = vld [vmem:[%s1653_s3 + $0xf4] sm:$0xf0] }
  0x26   : > { %433 = vmatpush.bf16.msra.mxu0 %v868_v2  ;;  %445 = vmatpush.bf16.msra.mxu1 %v940_v16  ;;  %v1178_v49 = vld [vmem:[%s1653_s3 + $0xf4] sm:$0xf]  ;;  %v1109_v50 = vld [vmem:[%s1653_s3 + $0xf8] sm:$0xf0]  ;;  %v1040_v51 = vor.u32 %v1160_v44, %v1037_v45  ;;  %v1108_v52 = vor.u32 %v1179_v48, %v1107_v46  ;;  %v1027_v54 = vld [vmem:[%s1653_s3 + $0x50] sm:$0xf] }
  0x27   : > { %459 = vmatpush.bf16.msra.mxu2 %v872_v7  ;;  %v1112_v53 = vor.u32 %v1178_v49, %v1109_v50  ;;  %v1159_v55 = vld [vmem:[%s1653_s3 + $0x54] sm:$0xf0]  ;;  %v1158_v56 = vld [vmem:[%s1653_s3 + $0x54] sm:$0xf]  ;;  %v1029_v57 = vld [vmem:[%s1653_s3 + $0x58] sm:$0xf0] }
  0x28   : > { %471 = vmatpush.bf16.msra.mxu3 %v944_v23  ;;  %v1099_v58 = vld [vmem:[%s1653_s3 + $0xe0] sm:$0xf]  ;;  %v1177_v59 = vld [vmem:[%s1653_s3 + $0xe4] sm:$0xf0]  ;;  %v1176_v61 = vld [vmem:[%s1653_s3 + $0xe4] sm:$0xf]  ;;  %v1028_v63 = vor.u32 %v1159_v55, %v1027_v54  ;;  %v1032_v3 = vor.u32 %v1158_v56, %v1029_v57 }
  0x29   : > { %v1100_v60 = vor.u32 %v1177_v59, %v1099_v58  ;;  %v1101_v62 = vld [vmem:[%s1653_s3 + $0xe8] sm:$0xf0]  ;;  %v1019_v1 = vld [vmem:[%s1653_s3 + $0x40] sm:$0xf]  ;;  %v1157_v2 = vld [vmem:[%s1653_s3 + $0x44] sm:$0xf0] }
  0x2a   : > { %434 = vmatpush.bf16.msra.mxu0 %v860_v15  ;;  %446 = vmatpush.bf16.msra.mxu1 %v932_v27  ;;  %v1104_v0 = vor.u32 %v1176_v61, %v1101_v62  ;;  %v1091_v4 = vld [vmem:[%s1653_s3 + $0xd0] sm:$0xf]  ;;  %v1175_v5 = vld [vmem:[%s1653_s3 + $0xd4] sm:$0xf0]  ;;  %v1174_v6 = vld [vmem:[%s1653_s3 + $0xd4] sm:$0xf]  ;;  %v1020_v12 = vor.u32 %v1157_v2, %v1019_v1 }
  0x2b   : > { %460 = vmatpush.bf16.msra.mxu2 %v864_v20  ;;  %v1156_v7 = vld [vmem:[%s1653_s3 + $0x44] sm:$0xf]  ;;  %v1021_v8 = vld [vmem:[%s1653_s3 + $0x48] sm:$0xf0]  ;;  %v1093_v9 = vld [vmem:[%s1653_s3 + $0xd8] sm:$0xf0]  ;;  %v1092_v10 = vor.u32 %v1175_v5, %v1091_v4 }
  0x2c   : > { %472 = vmatpush.bf16.msra.mxu3 %v936_v29  ;;  %v1096_v11 = vor.u32 %v1174_v6, %v1093_v9  ;;  %v1024_v13 = vor.u32 %v1156_v7, %v1021_v8  ;;  %v1011_v20 = vld [vmem:[%s1653_s3 + $0x30] sm:$0xf]  ;;  %v1155_v21 = vld [vmem:[%s1653_s3 + $0x34] sm:$0xf0]  ;;  %v1154_v22 = vld [vmem:[%s1653_s3 + $0x34] sm:$0xf] }
  0x2d   : > { %v1012_v23 = vor.u32 %v1155_v21, %v1011_v20  ;;  %v1013_v24 = vld [vmem:[%s1653_s3 + $0x38] sm:$0xf0]  ;;  %v1083_v26 = vld [vmem:[%s1653_s3 + $0xc0] sm:$0xf]  ;;  %v1173_v27 = vld [vmem:[%s1653_s3 + $0xc4] sm:$0xf0] }
  0x2e   : > { %447 = vmatpush.bf16.msra.mxu1 %v924_v34  ;;  %676 = vmatpush.bf16.msrb.mxu0 %v1044_v39  ;;  %v1016_v25 = vor.u32 %v1154_v22, %v1013_v24  ;;  %v1172_v28 = vld [vmem:[%s1653_s3 + $0xc4] sm:$0xf]  ;;  %v1084_v29 = vor.u32 %v1173_v27, %v1083_v26  ;;  %v1085_v30 = vld [vmem:[%s1653_s3 + $0xc8] sm:$0xf0]  ;;  %v1003_v31 = vld [vmem:[%s1653_s3 + $0x20] sm:$0xf] }
  0x2f   : > { %702 = vmatpush.bf16.msrb.mxu2 %v1048_v43  ;;  %v1153_v32 = vld [vmem:[%s1653_s3 + $0x24] sm:$0xf0]  ;;  %v1088_v33 = vor.u32 %v1172_v28, %v1085_v30  ;;  %v1005_v36 = vld [vmem:[%s1653_s3 + $0x28] sm:$0xf0]  ;;  %v1075_v38 = vld [vmem:[%s1653_s3 + $0xb0] sm:$0xf] }
  0x30   : > { %473 = vmatpush.bf16.msra.mxu3 %v928_v35  ;;  %v1004_v34 = vor.u32 %v1153_v32, %v1003_v31  ;;  %v1152_v35 = vld [vmem:[%s1653_s3 + $0x24] sm:$0xf]  ;;  %v1171_v39 = vld [vmem:[%s1653_s3 + $0xb4] sm:$0xf0]  ;;  %v1170_v40 = vld [vmem:[%s1653_s3 + $0xb4] sm:$0xf] }
  0x31   : > { %v1008_v37 = vor.u32 %v1152_v35, %v1005_v36  ;;  %v1076_v41 = vor.u32 %v1171_v39, %v1075_v38  ;;  %v1077_v42 = vld [vmem:[%s1653_s3 + $0xb8] sm:$0xf0]  ;;  %v995_v44 = vld [vmem:[%s1653_s3 + $0x10] sm:$0xf]  ;;  %v1151_v45 = vld [vmem:[%s1653_s3 + $0x14] sm:$0xf0] }
  0x32   : > { %689 = vmatpush.bf16.msrb.mxu1 %v1108_v52  ;;  %677 = vmatpush.bf16.msrb.mxu0 %v1036_v47  ;;  %v1080_v43 = vor.u32 %v1170_v40, %v1077_v42  ;;  %v1150_v46 = vld [vmem:[%s1653_s3 + $0x14] sm:$0xf]  ;;  %v996_v47 = vor.u32 %v1151_v45, %v995_v44  ;;  %v997_v48 = vld [vmem:[%s1653_s3 + $0x18] sm:$0xf0]  ;;  %v1067_v50 = vld [vmem:[%s1653_s3 + $0xa0] sm:$0xf] }
  0x33   : > { %703 = vmatpush.bf16.msrb.mxu2 %v1040_v51  ;;  %v1000_v49 = vor.u32 %v1150_v46, %v997_v48  ;;  %v1169_v51 = vld [vmem:[%s1653_s3 + $0xa4] sm:$0xf0]  ;;  %v1168_v52 = vld [vmem:[%s1653_s3 + $0xa4] sm:$0xf]  ;;  %v1069_v54 = vld [vmem:[%s1653_s3 + $0xa8] sm:$0xf0] }
  0x34   : > { %715 = vmatpush.bf16.msrb.mxu3 %v1112_v53  ;;  %v1068_v53 = vor.u32 %v1169_v51, %v1067_v50  ;;  %v1072_v55 = vor.u32 %v1168_v52, %v1069_v54  ;;  %v987_v56 = vld [vmem:[%s1653_s3] sm:$0xf]  ;;  %v1149_v57 = vld [vmem:[%s1653_s3 + $0x4] sm:$0xf0]  ;;  %v1148_v59 = vld [vmem:[%s1653_s3 + $0x4] sm:$0xf] }
  0x35   : > { %v988_v58 = vor.u32 %v1149_v57, %v987_v56  ;;  %v1059_v62 = vld [vmem:[%s1653_s3 + $0x90] sm:$0xf]  ;;  %v1061_v2 = vld [vmem:[%s1653_s3 + $0x98] sm:$0xf0]  ;;  %v1051_v4 = vld [vmem:[%s1653_s3 + $0x80] sm:$0xf] }
  0x36   : > { %690 = vmatpush.bf16.msrb.mxu1 %v1100_v60  ;;  %678 = vmatpush.bf16.msrb.mxu0 %v1028_v63  ;;  %v989_v60 = vld [vmem:[%s1653_s3 + $0x8] sm:$0xf0]  ;;  %v1167_v63 = vld [vmem:[%s1653_s3 + $0x94] sm:$0xf0]  ;;  %v1165_v5 = vld [vmem:[%s1653_s3 + $0x84] sm:$0xf0] }
  0x37   : > { %704 = vmatpush.bf16.msrb.mxu2 %v1032_v3  ;;  %v992_v61 = vor.u32 %v1148_v59, %v989_v60  ;;  %v1060_v1 = vor.u32 %v1167_v63, %v1059_v62  ;;  %v1164_v6 = vld [vmem:[%s1653_s3 + $0x84] sm:$0xf]  ;;  %v1052_v7 = vor.u32 %v1165_v5, %v1051_v4  ;;  %v1053_v8 = vld [vmem:[%s1653_s3 + $0x88] sm:$0xf0]  ;;  %v1199_v26 = vmov 0.0  }
  0x38   : > { %716 = vmatpush.bf16.msrb.mxu3 %v1104_v0  ;;  %v1166_v0 = vld [vmem:[%s1653_s3 + $0x94] sm:$0xf]  ;;  %v1056_v9 = vor.u32 %v1164_v6, %v1053_v8 }
  0x39   : > { %v1064_v3 = vor.u32 %v1166_v0, %v1061_v2 }
  0x3a   : > { %691 = vmatpush.bf16.msrb.mxu1 %v1092_v10  ;;  %679 = vmatpush.bf16.msrb.mxu0 %v1020_v12 }
  0x3b   : > { %705 = vmatpush.bf16.msrb.mxu2 %v1024_v13 }
  0x3c   : > { %717 = vmatpush.bf16.msrb.mxu3 %v1096_v11 }
  0x3e   : > { %680 = vmatpush.bf16.msrb.mxu0 %v1012_v23  ;;  %692 = vmatpush.bf16.msrb.mxu1 %v1084_v29 }
  0x3f   : > { %706 = vmatpush.bf16.msrb.mxu2 %v1016_v25  ;;  %v728_v25 = vlaneseq }
  0x40   : > { %718 = vmatpush.bf16.msrb.mxu3 %v1088_v33 }
  0x41   : > { %vm730_vm2 = vcmp.lt.s32.totalorder %v728_v25, 256 }
  0x42   : > { %681 = vmatpush.bf16.msrb.mxu0 %v1004_v34  ;;  %693 = vmatpush.bf16.msrb.mxu1 %v1076_v41  ;;  %732 = vst.msk [vmem:[#allocation3] ss:$8 sm:$0x3] %vm730_vm2, %v1199_v26 }
  0x43   : > { %707 = vmatpush.bf16.msrb.mxu2 %v1008_v37  ;;  %735 = vst.msk [vmem:[#allocation3 + $0x11] ss:$8 sm:$0x3] %vm730_vm2, %v1199_v26 }
  0x44   : > { %719 = vmatpush.bf16.msrb.mxu3 %v1080_v43 }
  0x46   : > { %682 = vmatpush.bf16.msrb.mxu0 %v996_v47  ;;  %694 = vmatpush.bf16.msrb.mxu1 %v1068_v53 }
  0x47   : > { %708 = vmatpush.bf16.msrb.mxu2 %v1000_v49 }
  0x48   : > { %720 = vmatpush.bf16.msrb.mxu3 %v1072_v55 }
  0x4a   : > { %683 = vmatpush.bf16.msrb.mxu0 %v988_v58  ;;  %695 = vmatpush.bf16.msrb.mxu1 %v1060_v1 }
  0x4b   : > { %709 = vmatpush.bf16.msrb.mxu2 %v992_v61 }
  0x4c   : > { %721 = vmatpush.bf16.msrb.mxu3 %v1064_v3 }
  0x4e   : > { %696 = vmatpush.bf16.msrb.mxu1 %v1052_v7 }
  0x50   : > { %722 = vmatpush.bf16.msrb.mxu3 %v1056_v9 }
  0x83   : > { %v219_v14 = vpop.permute.xlu0 %218 }
  0x84   : > { %222 = vst.msk [vmem:[#allocation2] sm:$0xff] %vm221_vm1, %v219_v14  ;;  %v479_v14 = vld [vmem:[%s208_s30] sm:$0xff] }
  0x8b   : > { %v228_v15 = vpop.permute.xlu0 %227  ;;  %v231_v16 = vld [vmem:[#allocation2] sm:$0xff] }
  0x8c   : > { %230 = vst.msk [vmem:[#allocation2 + $0x8] sm:$0xff] %vm221_vm1, %v228_v15  ;;  %v233_v17 = vpack.c.bf16 %v231_v16, %v231_v16 }
  0x8e   : > { %435 = vmatmul.bf16.vlgmr.msra.gmra.mxu0 %v233_v17  ;;  %461 = vmatmul.bf16.vlgmr.msra.gmra.mxu2 %v233_v17 }
  0x93   : > { %v232_v18 = vld [vmem:[#allocation2 + $0x8] sm:$0xff] }
  0x94   : > { %v234_v19 = vpack.c.bf16 %v232_v18, %v232_v18 }
  0x96   : > { %448 = vmatmul.bf16.vlgmr.msra.gmra.mxu1 %v234_v19  ;;  %474 = vmatmul.bf16.vlgmr.msra.gmra.mxu3 %v234_v19 }
 0x10b   : > { %v436_v10 = vpop.f32.mrf.mxu0 }
 0x111   : > { %v462_v11 = vpop.f32.mrf.mxu2 }
 0x113   : > { %v438_v12 = vpop.f32.mrf.mxu0  ;;  %v449_v13 = vpop.f32.mrf.mxu1 }
 0x114   : > { %v450_v15 = vadd.f32 %v449_v13, %v436_v10 }
 0x116   : > { %v480_v16 = vmul.f32 %v479_v14, %v450_v15 }
 0x118   : > { %v482_v17 = vpack.c.bf16 %v480_v16, %v480_v16 }
 0x119   : > { %v464_v18 = vpop.f32.mrf.mxu2  ;;  %v475_v19 = vpop.f32.mrf.mxu3 }
 0x11a   : > { %v476_v20 = vadd.f32 %v475_v19, %v462_v11  ;;  %684 = vmatmul.bf16.vlgmr.msrb.gmra.mxu0 %v482_v17  ;;  %710 = vmatmul.bf16.vlgmr.msrb.gmra.mxu2 %v482_v17 }
 0x11b   : > { %v451_v21 = vpop.f32.mrf.mxu1 }
 0x11c   : > { %v481_v22 = vmul.f32 %v479_v14, %v476_v20 }
 0x11e   : > { %v483_v23 = vpack.c.bf16 %v481_v22, %v481_v22 }
 0x120   : > { %697 = vmatmul.bf16.vlgmr.msrb.gmra.mxu1 %v483_v23  ;;  %723 = vmatmul.bf16.vlgmr.msrb.gmra.mxu3 %v483_v23 }
 0x121   : > { %v477_v24 = vpop.f32.mrf.mxu3 }
 0x197   : > { %v685_v27 = vpop.f32.mrf.mxu0 }
 0x19d   : > { %v698_v28 = vpop.f32.mrf.mxu1  ;;  %v711_v29 = vpop.f32.mrf.mxu2 }
 0x19e   : > { %v699_v30 = vadd.f32 %v698_v28, %v685_v27 }
 0x19f   : > { %v687_v31 = vpop.f32.mrf.mxu0 }
 0x1a0   : > { %v739_v32 = vrot.slane %v699_v30, 7 }
 0x1a2   : > { %743 = vst [vmem:[#allocation3] sm:$0xfe] %v739_v32 }
 0x1a3   : > { %745 = vst [vmem:[#allocation3 + $0x10] sm:$0x1] %v739_v32  ;;  %v724_v33 = vpop.f32.mrf.mxu3 }
 0x1a4   : > { %v725_v34 = vadd.f32 %v724_v33, %v711_v29 }
 0x1a5   : > { %v700_v35 = vpop.f32.mrf.mxu1  ;;  %v713_v36 = vpop.f32.mrf.mxu2 }
 0x1a6   : > { %v740_v37 = vrot.slane %v725_v34, 7 }
 0x1a8   : > { %744 = vst [vmem:[#allocation3 + $0x8] sm:$0xfe] %v740_v37 }
 0x1a9   : > { %v749_v38 = vld [vmem:[#allocation3] sm:$0xfc] }
 0x1aa   : > { %v754_v39 = vrot.slane %v749_v38, 7  ;;  %v750_v41 = vld [vmem:[#allocation3 + $0x10] sm:$0x1]  ;;  %v747_v48 = vld [vmem:[#allocation3] sm:$0xf8] }
 0x1ab   : > { %v726_v40 = vpop.f32.mrf.mxu3  ;;  %v755_v43 = vrot.slane %v750_v41, 7  ;;  %v748_v54 = vld [vmem:[#allocation3 + $0x10] sm:$0x3] }
 0x1ac   : > { %757 = vrot.lane.b32.xlu1 %v754_v39, %s1198_s29 }
 0x1ad   : > { %v756_v45 = vsel %vm753_vm3, %v754_v39, %v755_v43 }
 0x1af   : > { %v771_v42 = vld [vmem:[#allocation3 + $0x8] sm:$0x7f] }
 0x1b0   : > { %v773_v44 = vrot.slane %v771_v42, 5  ;;  %v765_v46 = vld [vmem:[#allocation3 + $0x8] sm:$0xfe] }
 0x1b1   : > { %v767_v49 = vrot.slane %v765_v46, 6 }
 0x1b2   : > { %774 = vrot.lane.b32.xlu2 %v773_v44, %s1198_s29 }
 0x1b4   : > { %759 = vrot.lane.b32.xlu1 %v756_v45, %s1198_s29 }
 0x20c   : > { %v775_v52 = vpop.permute.xlu2 %774 }
 0x21e   : > { %v758_v47 = vpop.permute.xlu1 %757 }
 0x21f   : > { %v763_v50 = vadd.f32 %v758_v47, %v747_v48 }
 0x221   : > { %v769_v51 = vadd.f32 %v767_v49, %v763_v50 }
 0x223   : > { %v777_v53 = vadd.f32 %v775_v52, %v769_v51 }
 0x225   : > { %780 = vst.msk [vmem:[%s212_s7 - $0x3] sm:$0xf8] %vm779_vm4, %v777_v53 }
 0x226   : > { %v760_v55 = vpop.permute.xlu1 %759 }
 0x227   : > { %v764_v56 = vadd.f32 %v760_v55, %v748_v54 }
 0x229   : > { %v770_v57 = vadd.f32 %v767_v49, %v764_v56 }
 0x22b   : > { %v778_v58 = vadd.f32 %v775_v52, %v770_v57 }
 0x22d   : > { %782 = vst.msk [vmem:[%s212_s7 + $0x5] sm:$0x3] %vm781_vm5, %v778_v58 }
 0x22e PF: > { %s14_s15 = sadd.s32 1, %s1196_s15  }
 0x22f   : > { %p11_p4 = scmp.ge.s32.totalorder %s14_s15, 4  }
 0x231   :  { %13 = sbr.rel (!%p11_p4) target bundleno = 1 (0x1), region = 70 }

</bundles_post_ra>
